<compile_context>
chip_gen: v7x
topology: tpu7x:2x2x1
jax: 0.10.0
libtpu: 0.0.40
codegen_flags: <defaults>
</compile_context>

<pallas_src>
import functools

import numpy as np
import jax
import jax.numpy as jnp
from jax.experimental import pallas as pl
from jax.experimental.pallas import tpu as pltpu

LOG_2PI = float(np.log(2.0 * np.pi))


def _prior_kernel(nodes_ref, ze_ref, em_ref, out_ref, px_sc, ph_sc, pe_sc,
                  *, n, d, h):
    # Grid: (batch tile i, lane tile j over the N*N edge axis).
    # nodes_ref: (bt, N*(D+H+1))  [z_x | z_h | node_mask], fetched once per i.
    # ze_ref / em_ref: (bt, wl)   lane slices of z_edge / edge_mask.
    # out_ref: (bt, 4)            [log_pz, log_px, log_ph, log_pe], resident
    #                             across the lane axis (written at last j).
    j = pl.program_id(1)

    @pl.when(j == 0)
    def _():
        nodes = nodes_ref[...].astype(jnp.float32)
        nd = n * d
        nh = n * h
        zx = nodes[:, :nd]
        zh = nodes[:, nd:nd + nh]
        nm = nodes[:, nd + nh:]
        sum_x2 = jnp.sum(zx * zx, axis=1, keepdims=True)      # (bt, 1)
        sum_h2 = jnp.sum(zh * zh, axis=1, keepdims=True)      # (bt, 1)
        n_nodes = jnp.sum(nm, axis=1, keepdims=True)          # (bt, 1)
        # TODO(synk): the PyTorch reference also runs "properly masked" /
        # mean-zero runtime asserts; those checks are omitted.  Relying on
        # that contract lets the element-wise mask multiply fold into the
        # count terms below.
        px_sc[...] = -0.5 * sum_x2 - (0.5 * d * LOG_2PI) * (n_nodes - 1.0)
        ph_sc[...] = -0.5 * sum_h2 - (0.5 * h * LOG_2PI) * n_nodes
        pe_sc[...] = jnp.zeros_like(n_nodes)

    # Fused load -> upcast -> square -> lane-reduce on the big streams.
    ze = ze_ref[...].astype(jnp.float32)
    sum_e2 = jnp.sum(ze * ze, axis=1, keepdims=True)           # (bt, 1)
    n_edges = jnp.sum(em_ref[...].astype(jnp.float32), axis=1, keepdims=True)
    pe_sc[...] += -0.5 * sum_e2 - (0.5 * LOG_2PI) * n_edges

    @pl.when(j == pl.num_programs(1) - 1)
    def _():
        px = px_sc[...]
        ph = ph_sc[...]
        pe = pe_sc[...]
        out_ref[...] = jnp.concatenate([px + ph + pe, px, ph, pe], axis=1)


def _round_up(x, m):
    return (x + m - 1) // m * m


def position_feature_edge_prior_forward(z_x, z_h, z_edge, node_mask, edge_mask):
    """Pallas equivalent of PositionFeatureEdgePrior.forward (in_edge_nf == 1).

    z_x: (B, N, D), z_h: (B, N, H), z_edge: (B, N, N) (or (B, N*N[, 1])),
    node_mask: (B, N) (or (B, N, 1)), edge_mask: anything reshapeable to
    (B, N*N).  Masks may be float32/bf16/int8/bool.
    Returns (log_pz, (log_pz_x, log_pz_h, log_pz_edge)), each (B,) float32.
    """
    B, N, D = z_x.shape
    H = z_h.shape[2]

    # ---- lane-dense slabs (free / tiny reshapes & casts) --------------------
    node_dt = jnp.result_type(z_x.dtype, z_h.dtype)
    if not jnp.issubdtype(node_dt, jnp.floating):
        node_dt = jnp.float32
    # One small per-node slab [z_x | z_h | node_mask]: 3 HBM streams instead
    # of 5.  Mask values 0/1 are exact in any float dtype.
    nodes = jnp.concatenate(
        [z_x.reshape(B, N * D).astype(node_dt),
         z_h.reshape(B, N * H).astype(node_dt),
         node_mask.reshape(B, N).astype(node_dt)], axis=1)
    ze2 = z_edge.reshape(B, -1)        # (B, N*N), native dtype
    em2 = edge_mask.reshape(B, -1)     # (B, N*N), native dtype (narrow dtypes OK)
    We = ze2.shape[1]
    assert em2.shape[1] == We, "in_edge_nf must be 1 (z_edge/edge_mask 1:1)"
    node_w = nodes.shape[1]

    # ---- VMEM budgeting (per generation) ------------------------------------
    try:
        vmem_cap = int(pltpu.get_tpu_info().vmem_capacity_bytes)
    except Exception:
        vmem_cap = 64 * 1024 * 1024            # conservative (v7x per-core VMEM)
    vmem_limit = max(16 * 1024 * 1024, min(vmem_cap // 2, 64 * 1024 * 1024))
    budget = (vmem_limit * 3) // 5             # block set incl. 2x buffering + f32 temps

    def _sublane(dt):
        return max(8, 32 // dt.itemsize)       # f32 -> 8, bf16 -> 16, int8/bool -> 32

    bmult = max(_sublane(nodes.dtype), _sublane(ze2.dtype), _sublane(em2.dtype))
    b_pad = _round_up(B, bmult)

    # Effective per-row VMEM cost: 2x native (double-buffered input blocks)
    # plus f32 in-kernel temporaries.
    small_eff = 2 * nodes.dtype.itemsize * node_w + 4 * node_w
    big_eff_lane = 2 * (ze2.dtype.itemsize + em2.dtype.itemsize) + 8

    rows_fit = budget // max(small_eff + big_eff_lane * We, 1)
    if rows_fit >= bmult:
        # Whole N*N row pair fits: single lane step, grow the batch tile.
        wl = We
        bt_cap = min(512, b_pad, (rows_fit // bmult) * bmult)
    else:
        # Even the minimum batch tile doesn't fit a full (bt, N*N) pair:
        # split the lane (reduction) axis so large N still fits VMEM.
        bt_cap = bmult
        lane_budget = max(budget // bmult - small_eff, 128 * big_eff_lane)
        wl_cap = max(128, (lane_budget // big_eff_lane) // 128 * 128)
        wl = 0
        if We % 128 == 0:
            w = min(wl_cap, We)
            while w >= 128:
                if We % w == 0:
                    wl = w
                    break
                w -= 128
        if wl == 0:
            # Rare fallback: no 128-aligned divisor of N*N -> zero-pad the lane
            # axis of the two big streams (zeros are neutral for the sums).
            wl = min(wl_cap, _round_up(We, 128))
            we_pad = _round_up(We, wl)
            ze2 = jnp.pad(ze2, ((0, 0), (0, we_pad - We)))
            em2 = jnp.pad(em2, ((0, 0), (0, we_pad - We)))
    n_lane = ze2.shape[1] // wl

    # Batch tile: a divisor of the aligned batch (no whole-input pad copy),
    # clamped so the grid keeps >=2 (ideally >=4) batch steps for v7x's two
    # TensorCores whenever that keeps bt >= the sublane minimum.
    start = max(bmult, min(bt_cap, b_pad))
    if b_pad >= 4 * bmult:
        start = min(start, (b_pad // 4) // bmult * bmult)
    elif b_pad >= 2 * bmult:
        start = min(start, (b_pad // 2) // bmult * bmult)
    start = max(start, bmult)
    bt = bmult
    w = start
    while w >= bmult:
        if b_pad % w == 0:
            bt = w
            break
        w -= bmult

    def pad_b(a):
        if a.shape[0] == b_pad:
            return a
        return jnp.pad(a, ((0, b_pad - a.shape[0]), (0, 0)))

    bytes_in = (nodes.size * nodes.dtype.itemsize
                + ze2.size * ze2.dtype.itemsize
                + em2.size * em2.dtype.itemsize)
    cost = pl.CostEstimate(flops=2 * (nodes.size + 2 * ze2.size) + 16 * b_pad,
                           transcendentals=0,
                           bytes_accessed=bytes_in + 16 * b_pad)

    kernel = functools.partial(_prior_kernel, n=N, d=D, h=H)

    out = pl.pallas_call(
        kernel,
        out_shape=jax.ShapeDtypeStruct((b_pad, 4), jnp.float32),
        grid=(b_pad // bt, n_lane),
        in_specs=[
            pl.BlockSpec((bt, node_w), lambda i, j: (i, 0)),   # fetched once per batch tile
            pl.BlockSpec((bt, wl), lambda i, j: (i, j)),
            pl.BlockSpec((bt, wl), lambda i, j: (i, j)),
        ],
        out_specs=pl.BlockSpec((bt, 4), lambda i, j: (i, 0)),  # resident across lane axis
        scratch_shapes=[pltpu.VMEM((bt, 1), jnp.float32)] * 3,
        compiler_params=pltpu.CompilerParams(
            dimension_semantics=("parallel", "arbitrary"),
            vmem_limit_bytes=int(vmem_limit)),
        cost_estimate=cost,
    )(pad_b(nodes), pad_b(ze2), pad_b(em2))

    log_pz = out[:B, 0]
    log_px = out[:B, 1]
    log_ph = out[:B, 2]
    log_pe = out[:B, 3]
    return log_pz, (log_px, log_ph, log_pe)


def _reference(z_x, z_h, z_edge, node_mask, edge_mask):
    z_x = z_x.astype(jnp.float32)
    z_h = z_h.astype(jnp.float32)
    z_edge = z_edge.astype(jnp.float32)
    m = node_mask.astype(jnp.float32)
    em = edge_mask.astype(jnp.float32)
    D = z_x.shape[2]

    r2 = jnp.sum(z_x * z_x, axis=(1, 2))
    n = jnp.sum(m, axis=1)
    log_px = -0.5 * r2 - 0.5 * (n - 1.0) * D * LOG_2PI

    elem_h = -0.5 * z_h * z_h - 0.5 * LOG_2PI
    log_ph = jnp.sum(elem_h * m[:, :, None], axis=(1, 2))

    elem_e = -0.5 * z_edge * z_edge - 0.5 * LOG_2PI
    log_pe = jnp.sum(elem_e * em, axis=(1, 2))

    return log_px + log_ph + log_pe, (log_px, log_ph, log_pe)


if __name__ == "__main__":
    # PositionFeatureEdgePrior(n_dim=3, in_node_nf=4, in_edge_nf=1): no params.
    B, N, D, H = 2, 8, 3, 4

    key = jax.random.PRNGKey(0)
    kx, kh, ke = jax.random.split(key, 3)

    node_mask = jnp.ones((B, N), dtype=jnp.float32)
    node_mask = node_mask.at[1, 6:].set(0.0)  # second sample has 6 real nodes
    eye = jnp.eye(N, dtype=jnp.float32)[None]
    edge_mask = node_mask[:, :, None] * node_mask[:, None, :] * (1.0 - eye)

    # Positions: mask and remove center of gravity (module's asserts expect it).
    z_x = jax.random.normal(kx, (B, N, D), dtype=jnp.float32)
    z_x = z_x * node_mask[:, :, None]
    cog = jnp.sum(z_x, axis=1, keepdims=True) / jnp.sum(
        node_mask, axis=1, keepdims=True)[:, :, None]
    z_x = (z_x - cog) * node_mask[:, :, None]

    z_h = jax.random.normal(kh, (B, N, H), dtype=jnp.float32)
    z_h = z_h * node_mask[:, :, None]

    z_edge = jax.random.normal(ke, (B, N, N), dtype=jnp.float32)  # in_edge_nf=1
    z_edge = z_edge * edge_mask

    log_pz, (lpx, lph, lpe) = position_feature_edge_prior_forward(
        z_x, z_h, z_edge, node_mask, edge_mask)
    jax.block_until_ready((log_pz, lpx, lph, lpe))

    ref_pz, (ref_px, ref_ph, ref_pe) = _reference(
        z_x, z_h, z_edge, node_mask, edge_mask)
    np.testing.assert_allclose(np.asarray(log_pz), np.asarray(ref_pz),
                               rtol=1e-5, atol=1e-5)
    np.testing.assert_allclose(np.asarray(lpx), np.asarray(ref_px),
                               rtol=1e-5, atol=1e-5)
    np.testing.assert_allclose(np.asarray(lph), np.asarray(ref_ph),
                               rtol=1e-5, atol=1e-5)
    np.testing.assert_allclose(np.asarray(lpe), np.asarray(ref_pe),
                               rtol=1e-5, atol=1e-5)

    print("KERNEL_OK")
</pallas_src>

<mosaic_0001>
module attributes {stable_mosaic.version = 11 : i64} {
  func.func @_prior_kernel(%arg0: i32, %arg1: i32, %arg2: memref<8x64xf32, #tpu.memory_space<vmem>>, %arg3: memref<8x64xf32, #tpu.memory_space<vmem>>, %arg4: memref<8x64xf32, #tpu.memory_space<vmem>>, %arg5: memref<8x4xf32, #tpu.memory_space<vmem>>, %arg6: memref<8x1xf32, #tpu.memory_space<vmem>>, %arg7: memref<8x1xf32, #tpu.memory_space<vmem>>, %arg8: memref<8x1xf32, #tpu.memory_space<vmem>>) attributes {dimension_semantics = [#tpu.dimension_semantics<parallel>, #tpu.dimension_semantics<arbitrary>], iteration_bounds = array<i64: 1, 1>, scalar_prefetch = 0 : i64, scratch_operands = 3 : i64, tpu.core_type = #tpu.core_type<tc>, window_params = [{transform_indices = @transform_0, window_bounds = array<i64: 8, 64>}, {transform_indices = @transform_1, window_bounds = array<i64: 8, 64>}, {transform_indices = @transform_2, window_bounds = array<i64: 8, 64>}, {transform_indices = @transform_3, window_bounds = array<i64: 8, 4>}]} {
    %c0_i32 = arith.constant 0 : i32
    %0 = arith.cmpi eq, %arg1, %c0_i32 : i32
    %1 = arith.extui %0 : i1 to i32
    %c0_i32_0 = arith.constant 0 : i32
    %2 = arith.cmpi ne, %1, %c0_i32_0 : i32
    scf.if %2 {
      %c0_13 = arith.constant 0 : index
      %c0_14 = arith.constant 0 : index
      %21 = vector.load %arg2[%c0_13, %c0_14] : memref<8x64xf32, #tpu.memory_space<vmem>>, vector<8x64xf32>
      %22 = vector.extract_strided_slice %21 {offsets = [0, 0], sizes = [8, 24], strides = [1, 1]} : vector<8x64xf32> to vector<8x24xf32>
      %23 = vector.extract_strided_slice %21 {offsets = [0, 24], sizes = [8, 32], strides = [1, 1]} : vector<8x64xf32> to vector<8x32xf32>
      %24 = vector.extract_strided_slice %21 {offsets = [0, 56], sizes = [8, 8], strides = [1, 1]} : vector<8x64xf32> to vector<8x8xf32>
      %25 = arith.mulf %22, %22 : vector<8x24xf32>
      %cst_15 = arith.constant dense<0.000000e+00> : vector<8xf32>
      %26 = vector.multi_reduction <add>, %25, %cst_15 [1] : vector<8x24xf32> to vector<8xf32>
      %27 = vector.shape_cast %26 : vector<8xf32> to vector<8x1xf32>
      %28 = arith.mulf %23, %23 : vector<8x32xf32>
      %cst_16 = arith.constant dense<0.000000e+00> : vector<8xf32>
      %29 = vector.multi_reduction <add>, %28, %cst_16 [1] : vector<8x32xf32> to vector<8xf32>
      %30 = vector.shape_cast %29 : vector<8xf32> to vector<8x1xf32>
      %cst_17 = arith.constant dense<0.000000e+00> : vector<8xf32>
      %31 = vector.multi_reduction <add>, %24, %cst_17 [1] : vector<8x8xf32> to vector<8xf32>
      %32 = vector.shape_cast %31 : vector<8xf32> to vector<8x1xf32>
      %cst_18 = arith.constant -5.000000e-01 : f32
      %33 = vector.broadcast %cst_18 : f32 to vector<8x1xf32>
      %34 = arith.mulf %33, %27 : vector<8x1xf32>
      %cst_19 = arith.constant 1.000000e+00 : f32
      %35 = vector.broadcast %cst_19 : f32 to vector<8x1xf32>
      %36 = arith.subf %32, %35 : vector<8x1xf32>
      %cst_20 = arith.constant 2.75681567 : f32
      %37 = vector.broadcast %cst_20 : f32 to vector<8x1xf32>
      %38 = arith.mulf %37, %36 : vector<8x1xf32>
      %39 = arith.subf %34, %38 : vector<8x1xf32>
      %c0_21 = arith.constant 0 : index
      %c0_22 = arith.constant 0 : index
      %40 = vector.load %arg6[%c0_21, %c0_22] : memref<8x1xf32, #tpu.memory_space<vmem>>, vector<8x1xf32>
      tpu.vector_store %arg6[%c0_21, %c0_22], %39 {strides = array<i32>} : memref<8x1xf32, #tpu.memory_space<vmem>>, vector<8x1xf32>,
      %cst_23 = arith.constant -5.000000e-01 : f32
      %41 = vector.broadcast %cst_23 : f32 to vector<8x1xf32>
      %42 = arith.mulf %41, %30 : vector<8x1xf32>
      %cst_24 = arith.constant 3.67575407 : f32
      %43 = vector.broadcast %cst_24 : f32 to vector<8x1xf32>
      %44 = arith.mulf %43, %32 : vector<8x1xf32>
      %45 = arith.subf %42, %44 : vector<8x1xf32>
      %c0_25 = arith.constant 0 : index
      %c0_26 = arith.constant 0 : index
      %46 = vector.load %arg7[%c0_25, %c0_26] : memref<8x1xf32, #tpu.memory_space<vmem>>, vector<8x1xf32>
      tpu.vector_store %arg7[%c0_25, %c0_26], %45 {strides = array<i32>} : memref<8x1xf32, #tpu.memory_space<vmem>>, vector<8x1xf32>,
      %cst_27 = arith.constant 0.000000e+00 : f32
      %47 = vector.broadcast %cst_27 : f32 to vector<8x1xf32>
      %c0_28 = arith.constant 0 : index
      %c0_29 = arith.constant 0 : index
      %48 = vector.load %arg8[%c0_28, %c0_29] : memref<8x1xf32, #tpu.memory_space<vmem>>, vector<8x1xf32>
      tpu.vector_store %arg8[%c0_28, %c0_29], %47 {strides = array<i32>} : memref<8x1xf32, #tpu.memory_space<vmem>>, vector<8x1xf32>,
    } else {
    }
    %c0 = arith.constant 0 : index
    %c0_1 = arith.constant 0 : index
    %3 = vector.load %arg3[%c0, %c0_1] : memref<8x64xf32, #tpu.memory_space<vmem>>, vector<8x64xf32>
    %4 = arith.mulf %3, %3 : vector<8x64xf32>
    %cst = arith.constant dense<0.000000e+00> : vector<8xf32>
    %5 = vector.multi_reduction <add>, %4, %cst [1] : vector<8x64xf32> to vector<8xf32>
    %6 = vector.shape_cast %5 : vector<8xf32> to vector<8x1xf32>
    %c0_2 = arith.constant 0 : index
    %c0_3 = arith.constant 0 : index
    %7 = vector.load %arg4[%c0_2, %c0_3] : memref<8x64xf32, #tpu.memory_space<vmem>>, vector<8x64xf32>
    %cst_4 = arith.constant dense<0.000000e+00> : vector<8xf32>
    %8 = vector.multi_reduction <add>, %7, %cst_4 [1] : vector<8x64xf32> to vector<8xf32>
    %9 = vector.shape_cast %8 : vector<8xf32> to vector<8x1xf32>
    %c0_5 = arith.constant 0 : index
    %c0_6 = arith.constant 0 : index
    %10 = vector.load %arg8[%c0_5, %c0_6] : memref<8x1xf32, #tpu.memory_space<vmem>>, vector<8x1xf32>
    %cst_7 = arith.constant -5.000000e-01 : f32
    %11 = vector.broadcast %cst_7 : f32 to vector<8x1xf32>
    %12 = arith.mulf %11, %6 : vector<8x1xf32>
    %cst_8 = arith.constant 0.918938517 : f32
    %13 = vector.broadcast %cst_8 : f32 to vector<8x1xf32>
    %14 = arith.mulf %13, %9 : vector<8x1xf32>
    %15 = arith.subf %12, %14 : vector<8x1xf32>
    %16 = arith.addf %10, %15 : vector<8x1xf32>
    %c0_9 = arith.constant 0 : index
    %c0_10 = arith.constant 0 : index
    %17 = vector.load %arg8[%c0_9, %c0_10] : memref<8x1xf32, #tpu.memory_space<vmem>>, vector<8x1xf32>
    tpu.vector_store %arg8[%c0_9, %c0_10], %16 {strides = array<i32>} : memref<8x1xf32, #tpu.memory_space<vmem>>, vector<8x1xf32>,
    %c0_i32_11 = arith.constant 0 : i32
    %18 = arith.cmpi eq, %arg1, %c0_i32_11 : i32
    %19 = arith.extui %18 : i1 to i32
    %c0_i32_12 = arith.constant 0 : i32
    %20 = arith.cmpi ne, %19, %c0_i32_12 : i32
    scf.if %20 {
      %c0_13 = arith.constant 0 : index
      %c0_14 = arith.constant 0 : index
      %21 = vector.load %arg6[%c0_13, %c0_14] : memref<8x1xf32, #tpu.memory_space<vmem>>, vector<8x1xf32>
      %c0_15 = arith.constant 0 : index
      %c0_16 = arith.constant 0 : index
      %22 = vector.load %arg7[%c0_15, %c0_16] : memref<8x1xf32, #tpu.memory_space<vmem>>, vector<8x1xf32>
      %c0_17 = arith.constant 0 : index
      %c0_18 = arith.constant 0 : index
      %23 = vector.load %arg8[%c0_17, %c0_18] : memref<8x1xf32, #tpu.memory_space<vmem>>, vector<8x1xf32>
      %24 = arith.addf %21, %22 : vector<8x1xf32>
      %25 = arith.addf %24, %23 : vector<8x1xf32>
      %26 = tpu.concatenate %25, %21, %22, %23 in 1 : vector<8x1xf32>, vector<8x1xf32>, vector<8x1xf32>, vector<8x1xf32> -> vector<8x4xf32>
      %c0_19 = arith.constant 0 : index
      %c0_20 = arith.constant 0 : index
      %27 = vector.load %arg5[%c0_19, %c0_20] : memref<8x4xf32, #tpu.memory_space<vmem>>, vector<8x4xf32>
      tpu.vector_store %arg5[%c0_19, %c0_20], %26 {strides = array<i32>} : memref<8x4xf32, #tpu.memory_space<vmem>>, vector<8x4xf32>,
    } else {
    }
    return
  }
  func.func @transform_0(%arg0: i32, %arg1: i32) -> (i32, i32) {
    %c0_i32 = arith.constant 0 : i32
    %c0_i32_0 = arith.constant 0 : i32
    return %arg0, %c0_i32 : i32, i32
  }
  func.func @transform_1(%arg0: i32, %arg1: i32) -> (i32, i32) {
    %c0_i32 = arith.constant 0 : i32
    return %arg0, %arg1 : i32, i32
  }
  func.func @transform_2(%arg0: i32, %arg1: i32) -> (i32, i32) {
    %c0_i32 = arith.constant 0 : i32
    return %arg0, %arg1 : i32, i32
  }
  func.func @transform_3(%arg0: i32, %arg1: i32) -> (i32, i32) {
    %c0_i32 = arith.constant 0 : i32
    %c0_i32_0 = arith.constant 0 : i32
    return %arg0, %c0_i32 : i32, i32
  }
}

</mosaic_0001>

<bundles_post_ra>
// kernel: tpu_custom_call.1
= control target key start
LH: loop header
LB: loop body
LE: loop exit
PB: predicated region body
PF: predicated region fallthrough
CT: control target
= control target key end

     0   :  { %8 = vsyncpa [#allocation6], 0  ;;  %s289_s0 = inlined_call_operand.hbm [shape: f32[8,64], index: 0, kind: input, shape index: {}]   ;;  %s290_s1 = inlined_call_operand.hbm [shape: f32[8,64], index: 1, kind: input, shape index: {}]   ;;  %s291_s2 = inlined_call_operand.hbm [shape: f32[8,64], index: 2, kind: input, shape index: {}]   ;;  %s292_s3 = inlined_call_operand.vmem [shape: f32[8,4], index: 3, kind: output, shape index: {}]  }
   0x1   :  { %9 = vsyncpa [#allocation8], 0  ;;  %s216_s12 = smov [#allocation7]   ;;  %s217_s14 = smov [#allocation5]  }
   0x2   :  { %s26_s13 = sshll.u32 %s216_s12, 4  ;;  %s16_s15 = sshll.u32 %s217_s14, 4  ;;  %s27_s13 = int_to_ptr.vmem [resolvable:$true] %s26_s13  ;;  %s17_s15 = int_to_ptr.vmem [resolvable:$true] %s16_s15 }
   0x3   :  { %s146_s18 = scalar_lea.hbm %s290_s1, 128 }
   0x4   :  { %p147_p0 = scmp.ne.s32.totalorder %s290_s1, %s146_s18  ;;  %p150_p1 = scmp.lt.u32.totalorder %s146_s18, %s290_s1 }
   0x6   :  { %p152_p2 = pnand %p150_p1, %p147_p0 }
   0x8   :  { %155 = shalt.err (!%p152_p2)
}
   0x9   :  { %s156_s23 = scalar_lea.vmem %s27_s13, 128  ;;  %p161_p4 = scmp.lt.s32.totalorder %s27_s13, %s27_s13 }
   0xa   :  { %p157_p3 = scmp.ne.s32.totalorder %s27_s13, %s156_s23  ;;  %p162_p5 = scmp.lt.s32.totalorder %s156_s23, %s156_s23 }
   0xc   :  { %p163_p6 = por %p162_p5, %p161_p4 }
   0xe   :  { %p164_p7 = pnand %p163_p6, %p157_p3 }
  0x10   :  { %167 = shalt.err (!%p164_p7)
}
  0x11   :  { %29 = dma.hbm_to_vmem [thread:$0]  %s290_s1, 128, %s27_s13, [#allocation8]  }
  0x12   :  { %s168_s28 = scalar_lea.hbm %s289_s0, 128 }
  0x13   :  { %p169_p8 = scmp.ne.s32.totalorder %s289_s0, %s168_s28  ;;  %p172_p9 = scmp.lt.u32.totalorder %s168_s28, %s289_s0 }
  0x15   :  { %p174_p10 = pnand %p172_p9, %p169_p8 }
  0x17   :  { %177 = shalt.err (!%p174_p10)
}
  0x18   :  { %s178_s6 = scalar_lea.vmem %s17_s15, 128  ;;  %p183_p12 = scmp.lt.s32.totalorder %s17_s15, %s17_s15 }
  0x19   :  { %p179_p11 = scmp.ne.s32.totalorder %s17_s15, %s178_s6  ;;  %p184_p13 = scmp.lt.s32.totalorder %s178_s6, %s178_s6 }
  0x1b   :  { %p185_p0 = por %p184_p13, %p183_p12 }
  0x1d   :  { %p186_p1 = pnand %p185_p0, %p179_p11 }
  0x1f   :  { %189 = shalt.err (!%p186_p1)
}
  0x20   :  { %19 = dma.hbm_to_vmem [thread:$0]  %s289_s0, 128, %s17_s15, [#allocation6]  }
  0x21   :  { %s218_s8 = smov [#allocation9]   ;;  %s190_s12 = scalar_lea.hbm %s291_s2, 128 }
  0x22   :  { %s36_s9 = sshll.u32 %s218_s8, 4  ;;  %p191_p2 = scmp.ne.s32.totalorder %s291_s2, %s190_s12  ;;  %s37_s9 = int_to_ptr.vmem [resolvable:$true] %s36_s9 }
  0x23   :  { %p194_p3 = scmp.lt.u32.totalorder %s190_s12, %s291_s2 }
  0x25   :  { %p196_p4 = pnand %p194_p3, %p191_p2 }
  0x27   :  { %199 = shalt.err (!%p196_p4)
}
  0x28   :  { %s200_s18 = scalar_lea.vmem %s37_s9, 128  ;;  %p205_p6 = scmp.lt.s32.totalorder %s37_s9, %s37_s9 }
  0x29   :  { %p201_p5 = scmp.ne.s32.totalorder %s37_s9, %s200_s18  ;;  %p206_p7 = scmp.lt.s32.totalorder %s200_s18, %s200_s18 }
  0x2b   :  { %p207_p8 = por %p206_p7, %p205_p6 }
  0x2d   :  { %p208_p9 = pnand %p207_p8, %p201_p5 }
  0x2f   :  { %211 = shalt.err (!%p208_p9)
}
  0x30   :  { %39 = dma.hbm_to_vmem [thread:$0]  %s291_s2, 128, %s37_s9, [#allocation8]  }
  0x31   :  { %212 = dma.done.wait [#allocation6], 128  }
  0x32   :  { %213 = vsyncadd [#allocation6], 4294967168 }
  0x33   :  { %214 = dma.done.wait [#allocation8], 256  }
  0x34   :  { %215 = vsyncadd [#allocation8], 4294967040  ;;  %v53_v0 = vld [vmem:[#allocation5] sm:$0xff]  ;;  %vm55_vm0 = vcmask 195584   ;;  %s219_s19 = smov 72   ;;  %vm88_vm1 = vcmask 523264  }
  0x35   :  { %68 = vrot.lane.b32.xlu0 %v53_v0, %s219_s19  ;;  %v54_v1 = vmul.f32 %v53_v0, %v53_v0  ;;  %v92_v2 = vld [vmem:[#allocation9] sm:$0xff]  ;;  %s220_s20 = smov 104   ;;  %v86_v5 = vld [vmem:[#allocation7] sm:$0xff]  ;;  %vm79_vm2 = vcmask 7168   ;;  %v221_v8 = vmov 0.0   ;;  %vm71_vm3 = vcmask 64512  }
  0x36   :  { %v93_v4 = vsel %vm88_vm1, %v92_v2, 0.0  ;;  %v87_v6 = vmul.f32 %v86_v5, %v86_v5  ;;  %85 = vst.msk [vmem:[#allocation4] sm:$0xff] %vm79_vm2, %v221_v8  ;;  %vm63_vm4 = vcmask 261120   ;;  %s222_s2 = smov 1   ;;  %s223_s21 = smov 2   ;;  %vm124_vm5 = vcmask 15360  }
  0x37   :  { %v56_v3 = vsel %vm55_vm0, %v54_v1, 0.0  ;;  %s224_s22 = smov 3   ;;  %vm126_vm6 = vcmask 23552   ;;  %vm128_vm7 = vcmask 31744  }
  0x38   :  { %57 = vadd.xlane.f32.xlu1 %v56_v3  ;;  %v89_v7 = vsel %vm88_vm1, %v87_v6, 0.0 }
  0x39   :  { %60 = vrot.lane.b32.xlu0 %v54_v1, %s220_s20 }
  0x3c   :  { %94 = vadd.xlane.f32.xlu1 %v93_v4 }
  0x3d   :  { %v96_v18 = vld [vmem:[#allocation4] sm:$0xff] }
  0x58   :  { %90 = vadd.xlane.f32.xlu0 %v89_v7 }
  0xa7   :  { %v69_v9 = vpop.permute.xlu0 %68 }
  0xa8   :  { %v72_v10 = vsel %vm71_vm3, %v69_v9, 0.0 }
  0xa9   :  { %73 = vadd.xlane.f32.xlu1 %v72_v10 }
  0xab   :  { %v61_v11 = vpop.permute.xlu0 %60 }
  0xac   :  { %v64_v12 = vsel %vm63_vm4, %v61_v11, 0.0 }
  0xad   :  { %65 = vadd.xlane.f32.xlu1 %v64_v12 }
  0xc5   :  { %v58_v13 = vpop.xlane.xlu1 %57 }
  0xc6   :  { %v75_v23 = vmul.f32 -0.5, %v58_v13 }
  0xc9   :  { %v95_v14 = vpop.xlane.xlu1 %94 }
  0xca   :  { %v98_v15 = vmul.f32 0.9189385, %v95_v14 }
  0xe5   :  { %v91_v16 = vpop.xlane.xlu0 %90 }
  0xe6   :  { %v97_v17 = vmul.f32 -0.5, %v91_v16 }
  0xe8   :  { %v99_v19 = vsub.f32 %v97_v17, %v98_v15 }
  0xea   :  { %v100_v20 = vadd.f32 %v99_v19, %v96_v18 }
  0xec   :  { %102 = vst.msk [vmem:[#allocation4] sm:$0xff] %vm79_vm2, %v100_v20 }
  0xf3   :  { %v108_v33 = vld [vmem:[#allocation4] sm:$0xff] }
 0x136   :  { %v74_v21 = vpop.xlane.xlu1 %73 }
 0x137   :  { %v136_v22 = vadd.f32 -1.0, %v74_v21  ;;  %v82_v27 = vmul.f32 3.675754, %v74_v21 }
 0x139   :  { %v77_v24 = vmul.f32 2.7568157, %v136_v22 }
 0x13a   :  { %v66_v25 = vpop.xlane.xlu1 %65 }
 0x13b   :  { %v78_v26 = vsub.f32 %v75_v23, %v77_v24  ;;  %v81_v28 = vmul.f32 -0.5, %v66_v25 }
 0x13d   :  { %80 = vst.msk [vmem:[#allocation2] sm:$0xff] %vm79_vm2, %v78_v26  ;;  %v83_v29 = vsub.f32 %v81_v28, %v82_v27 }
 0x13f   :  { %84 = vst.msk [vmem:[#allocation3] sm:$0xff] %vm79_vm2, %v83_v29 }
 0x144   :  { %v106_v30 = vld [vmem:[#allocation2] sm:$0xff] }
 0x145   :  { %112 = vrot.lane.b32.xlu1 %v106_v30, %s222_s2 }
 0x146   :  { %v107_v31 = vld [vmem:[#allocation3] sm:$0xff] }
 0x147   :  { %v109_v32 = vadd.f32 %v107_v31, %v106_v30 }
 0x149   :  { %116 = vrot.lane.b32.xlu1 %v107_v31, %s223_s21  ;;  %v110_v34 = vadd.f32 %v109_v32, %v108_v33 }
 0x14d   :  { %120 = vrot.lane.b32.xlu1 %v108_v33, %s224_s22 }
 0x1b7   :  { %v113_v35 = vpop.permute.xlu1 %112 }
 0x1b8   :  { %v123_v37 = vsel %vm79_vm2, %v110_v34, %v113_v35 }
 0x1bb   :  { %v117_v36 = vpop.permute.xlu1 %116 }
 0x1bc   :  { %v125_v38 = vsel %vm124_vm5, %v123_v37, %v117_v36 }
 0x1bf   :  { %v121_v39 = vpop.permute.xlu1 %120 }
 0x1c0   :  { %v127_v40 = vsel %vm126_vm6, %v125_v38, %v121_v39 }
 0x1c1   :  { %129 = vst.msk [vmem:[%s292_s3] sm:$0xff] %vm128_vm7, %v127_v40 }
 0x1c2   :  { %134 = vsyncpa [#allocation6], 1 }
 0x1c3   :  { %135 = vsyncpa [#allocation8], 1 }

</bundles_post_ra>
